<compile_context>
chip_gen: v7x
topology: tpu7x:2x2x1
jax: 0.10.0
libtpu: 0.0.40
codegen_flags: <defaults>
</compile_context>

<pallas_src>
import functools

import jax
import jax.numpy as jnp
from jax.experimental import pallas as pl
from jax.experimental.pallas import tpu as pltpu

NEG_INF = -1e30          # mask value for non-edges / padded logits
NEG_SLOPE = 0.2          # GATConv LeakyReLU slope
LANES = 128              # lane width used to pad the final classifier output


def _leaky_relu(x):
    return jnp.where(x > 0, x, NEG_SLOPE * x)


def _elu(x):
    return jnp.where(x > 0, x, jnp.exp(x) - 1.0)


# ----------------------------------------------------------------------------
# Kernel 1: conv1 projection + folded attention coefficients (one bf16 matmul)
# ----------------------------------------------------------------------------
def gat_proj_kernel(x_ref, w_ref, h_ref, coef_ref, *, heads, out_ch):
    """x tile [TM, F_in] (bf16) @ W_all [F_in, H*C + 2H] (bf16) -> f32.
    Columns [0, H*C) are the per-head projections (stored head-major, bf16);
    columns [H*C, H*C+2H) are the folded a_src / a_dst coefficients."""
    hc = heads * out_ch
    full = jnp.dot(x_ref[...], w_ref[...],
                   preferred_element_type=jnp.float32)          # [TM, H*C + 2H]
    for hd in range(heads):
        h_ref[hd] = full[:, hd * out_ch:(hd + 1) * out_ch].astype(h_ref.dtype)
    coef_ref[...] = full[:, hc:]                                # single store


# ----------------------------------------------------------------------------
# Kernel 2: conv1 attention + ELU, fused with conv2 projection epilogue
# ----------------------------------------------------------------------------
def gat_attn_proj_kernel(adj_ref, h_ref, asrc_ref, adst_ref, b_ref, w2_ref,
                         h2_ref, coef2_ref, acc_ref,
                         *, heads_in, c1, heads_out, c2):
    edge_mask = adj_ref[...] > 0                   # [TM, N] from int8 mask
    a_src = asrc_ref[...]                          # [H1, N]  lane-major rows
    a_dst = adst_ref[...]                          # [TM, H1] sublane-major cols

    for hd in range(heads_in):
        # e[i, j] = a_dst[i] + a_src[j]   (message j -> i)
        e = a_dst[:, hd:hd + 1] + a_src[hd:hd + 1, :]            # [TM, N]
        e = _leaky_relu(e)
        e = jnp.where(edge_mask, e, NEG_INF)
        m = jnp.max(e, axis=-1, keepdims=True)
        p = jnp.exp(e - m)
        denom = jnp.sum(p, axis=-1, keepdims=True)
        # normalize AFTER the matmul: scale lives on [TM, C1], not [TM, N]
        agg = jnp.dot(p.astype(jnp.bfloat16), h_ref[hd],
                      preferred_element_type=jnp.float32)        # [TM, C1]
        acc_ref[:, hd * c1:(hd + 1) * c1] = agg * pl.reciprocal(denom, approx=True)

    h1 = _elu(acc_ref[...] + b_ref[...])           # concat heads + bias + ELU
    # dropout between the two conv layers: identity in eval mode.

    # conv2 projection epilogue (folded coef columns); h1 never hits HBM.
    hc2 = heads_out * c2
    full2 = jnp.dot(h1.astype(jnp.bfloat16), w2_ref[...],
                    preferred_element_type=jnp.float32)          # [TM, H2*C2+2H2]
    for hd in range(heads_out):
        h2_ref[hd] = full2[:, hd * c2:(hd + 1) * c2].astype(h2_ref.dtype)
    coef2_ref[...] = full2[:, hc2:]


# ----------------------------------------------------------------------------
# Kernel 3: conv2 attention + mean-heads + ELU + Linear (lane-padded) + log_softmax
# ----------------------------------------------------------------------------
def gat_out_kernel(adj_ref, h_ref, asrc_ref, adst_ref, b_ref, wl_ref, bl_ref,
                   out_ref, *, heads):
    edge_mask = adj_ref[...] > 0
    a_src = asrc_ref[...]                          # [H2, N]
    a_dst = adst_ref[...]                          # [TM, H2]

    acc = None
    for hd in range(heads):
        e = a_dst[:, hd:hd + 1] + a_src[hd:hd + 1, :]
        e = _leaky_relu(e)
        e = jnp.where(edge_mask, e, NEG_INF)
        m = jnp.max(e, axis=-1, keepdims=True)
        p = jnp.exp(e - m)
        denom = jnp.sum(p, axis=-1, keepdims=True)
        agg = jnp.dot(p.astype(jnp.bfloat16), h_ref[hd],
                      preferred_element_type=jnp.float32)
        agg = agg * pl.reciprocal(denom, approx=True)            # [TM, C2]
        acc = agg if acc is None else acc + agg

    h = acc * (1.0 / heads) + b_ref[...]           # mean heads (concat=False) + bias
    h = _elu(h)

    # Final Linear into a 128-lane padded block (lane-dense store). Padded
    # columns carry bias = -1e30 and zero weights, so exp() removes them from
    # the log_softmax normalizer; the wrapper slices off the padding.
    z = jnp.dot(h, wl_ref[...], preferred_element_type=jnp.float32) + bl_ref[...]
    m = jnp.max(z, axis=-1, keepdims=True)
    s = z - m
    lse = jnp.log(jnp.sum(jnp.exp(s), axis=-1, keepdims=True))
    out_ref[...] = s - lse


# ----------------------------------------------------------------------------
# Wrapper
# ----------------------------------------------------------------------------
def _build_adj(edge_index, n):
    """Dense int8 adjacency mask adj[dst, src]=1 with self-loops (single scatter).
    NOTE: duplicate edges are deduped (PyG would count them as separate messages)."""
    loops = jnp.arange(n, dtype=edge_index.dtype)
    src = jnp.concatenate([edge_index[0], loops])
    dst = jnp.concatenate([edge_index[1], loops])
    return jnp.zeros((n, n), jnp.int8).at[dst, src].set(1)


def _fold_gat_weights(w, att_src, att_dst, heads, out_ch):
    """W_all = [W | W@att_src | W@att_dst]  (trace-time fold, per head)."""
    f_in = w.shape[0]
    w_h = w.reshape(f_in, heads, out_ch)
    wsrc = jnp.einsum("fhc,hc->fh", w_h, att_src)      # [F_in, H]
    wdst = jnp.einsum("fhc,hc->fh", w_h, att_dst)      # [F_in, H]
    return jnp.concatenate([w, wsrc, wdst], axis=1)    # [F_in, H*C + 2H]


def gat_citeseer_forward(x, edge_index, params, *, tile_m=128):
    n, f_in = x.shape
    assert n % tile_m == 0, "toy harness assumes N % tile_m == 0 (pad for real Citeseer)"
    h1_heads, h2_heads = params["heads1"], params["heads2"]
    c1, c2 = params["hid"], params["emb"]
    n_cls = params["wl"].shape[1]

    grid = (n // tile_m,)
    # 32 MiB scoped VMEM: above the 16 MiB v5e default, safely below the 64 MiB
    # v7x physical budget; raise per-generation for real-size N.
    cparams = pltpu.CompilerParams(dimension_semantics=("parallel",),
                                   vmem_limit_bytes=32 * 1024 * 1024)

    # int8 adjacency mask: exact (only compared > 0), halves the dominant HBM stream
    adj = _build_adj(edge_index, n)

    # trace-time parameter prep: folded weights in bf16, lane-padded classifier
    w1_all = _fold_gat_weights(params["w1"], params["att_src1"], params["att_dst1"],
                               h1_heads, c1).astype(jnp.bfloat16)
    w2_all = _fold_gat_weights(params["w2"], params["att_src2"], params["att_dst2"],
                               h2_heads, c2).astype(jnp.bfloat16)
    x_bf = x.astype(jnp.bfloat16)
    wl_pad = jnp.zeros((c2, LANES), jnp.float32).at[:, :n_cls].set(params["wl"])
    bl_pad = jnp.full((1, LANES), NEG_INF, jnp.float32).at[:, :n_cls].set(params["bl"])

    wall1, wall2 = w1_all.shape[1], w2_all.shape[1]

    k1_cost = pl.CostEstimate(
        flops=2 * n * f_in * wall1, transcendentals=0,
        bytes_accessed=n * f_in * 2 + f_in * wall1 * 2
                       + n * h1_heads * c1 * 2 + n * 2 * h1_heads * 4)
    k2_cost = pl.CostEstimate(
        flops=2 * n * n * h1_heads * c1 + 2 * n * h1_heads * c1 * wall2
              + 8 * n * n * h1_heads,
        transcendentals=n * n * h1_heads + n * h1_heads * c1,
        bytes_accessed=n * n * 1 + h1_heads * n * c1 * 2 + 2 * h1_heads * n * 4
                       + h2_heads * n * c2 * 2 + n * 2 * h2_heads * 4)
    k3_cost = pl.CostEstimate(
        flops=2 * n * n * h2_heads * c2 + 2 * n * c2 * LANES + 8 * n * n * h2_heads,
        transcendentals=n * n * h2_heads + n * c2 + n * LANES,
        bytes_accessed=n * n * 1 + h2_heads * n * c2 * 2 + 2 * h2_heads * n * 4
                       + n * LANES * 4)

    # ---- kernel 1: conv1 projection + folded attention coefficients --------
    h1_hm, coef1 = pl.pallas_call(
        functools.partial(gat_proj_kernel, heads=h1_heads, out_ch=c1),
        grid=grid,
        in_specs=[
            pl.BlockSpec((tile_m, f_in), lambda i: (i, 0)),       # x rows (bf16)
            pl.BlockSpec((f_in, wall1), lambda i: (0, 0)),        # W_all1 (resident)
        ],
        out_specs=[
            pl.BlockSpec((h1_heads, tile_m, c1), lambda i: (0, i, 0)),
            pl.BlockSpec((tile_m, 2 * h1_heads), lambda i: (i, 0)),
        ],
        out_shape=[
            jax.ShapeDtypeStruct((h1_heads, n, c1), jnp.bfloat16),
            jax.ShapeDtypeStruct((n, 2 * h1_heads), jnp.float32),
        ],
        compiler_params=cparams,
        cost_estimate=k1_cost,
    )(x_bf, w1_all)

    asrc1 = coef1[:, :h1_heads].T                 # [H1, N] lane-major (tiny XLA op)
    adst1 = coef1[:, h1_heads:]                   # [N, H1] sublane-major

    # ---- kernel 2: conv1 attention + ELU, fused conv2 projection -----------
    h2_hm, coef2 = pl.pallas_call(
        functools.partial(gat_attn_proj_kernel, heads_in=h1_heads, c1=c1,
                          heads_out=h2_heads, c2=c2),
        grid=grid,
        in_specs=[
            pl.BlockSpec((tile_m, n), lambda i: (i, 0)),          # adj row tile (int8)
            pl.BlockSpec((h1_heads, n, c1), lambda i: (0, 0, 0)), # h1 (resident)
            pl.BlockSpec((h1_heads, n), lambda i: (0, 0)),        # a_src (resident)
            pl.BlockSpec((tile_m, h1_heads), lambda i: (i, 0)),   # a_dst tile
            pl.BlockSpec((1, h1_heads * c1), lambda i: (0, 0)),   # conv1 bias
            pl.BlockSpec((h1_heads * c1, wall2), lambda i: (0, 0)),  # W_all2 (resident)
        ],
        out_specs=[
            pl.BlockSpec((h2_heads, tile_m, c2), lambda i: (0, i, 0)),
            pl.BlockSpec((tile_m, 2 * h2_heads), lambda i: (i, 0)),
        ],
        out_shape=[
            jax.ShapeDtypeStruct((h2_heads, n, c2), jnp.bfloat16),
            jax.ShapeDtypeStruct((n, 2 * h2_heads), jnp.float32),
        ],
        scratch_shapes=[pltpu.VMEM((tile_m, h1_heads * c1), jnp.float32)],
        compiler_params=cparams,
        cost_estimate=k2_cost,
    )(adj, h1_hm, asrc1, adst1, params["b1"], w2_all)

    asrc2 = coef2[:, :h2_heads].T
    adst2 = coef2[:, h2_heads:]

    # ---- kernel 3: conv2 attention + ELU + Linear + log_softmax ------------
    out_pad = pl.pallas_call(
        functools.partial(gat_out_kernel, heads=h2_heads),
        grid=grid,
        in_specs=[
            pl.BlockSpec((tile_m, n), lambda i: (i, 0)),          # adj row tile (int8)
            pl.BlockSpec((h2_heads, n, c2), lambda i: (0, 0, 0)), # h2 (resident)
            pl.BlockSpec((h2_heads, n), lambda i: (0, 0)),        # a_src (resident)
            pl.BlockSpec((tile_m, h2_heads), lambda i: (i, 0)),   # a_dst tile
            pl.BlockSpec((1, c2), lambda i: (0, 0)),              # conv2 bias
            pl.BlockSpec((c2, LANES), lambda i: (0, 0)),          # padded classifier W
            pl.BlockSpec((1, LANES), lambda i: (0, 0)),           # padded classifier b
        ],
        out_specs=pl.BlockSpec((tile_m, LANES), lambda i: (i, 0)),
        out_shape=jax.ShapeDtypeStruct((n, LANES), jnp.float32),
        compiler_params=cparams,
        cost_estimate=k3_cost,
    )(adj, h2_hm, asrc2, adst2, params["b2"], wl_pad, bl_pad)

    return out_pad[:, :n_cls]


# ----------------------------------------------------------------------------
# Pure-JAX reference (module math; mirrors the kernel's bf16-operand policy)
# ----------------------------------------------------------------------------
def _ref_gat_layer(x, adj, w, att_src, att_dst, bias, heads, out_ch, concat):
    h = jnp.dot(x.astype(jnp.bfloat16), w.astype(jnp.bfloat16),
                preferred_element_type=jnp.float32)
    outs = []
    for hd in range(heads):
        hs = h[:, hd * out_ch:(hd + 1) * out_ch]
        a_s = hs @ att_src[hd]
        a_d = hs @ att_dst[hd]
        e = a_d[:, None] + a_s[None, :]
        e = jnp.where(e > 0, e, NEG_SLOPE * e)
        e = jnp.where(adj > 0, e, NEG_INF)
        attn = jax.nn.softmax(e, axis=-1)
        outs.append(jnp.dot(attn.astype(jnp.bfloat16), hs.astype(jnp.bfloat16),
                            preferred_element_type=jnp.float32))
    out = jnp.concatenate(outs, -1) if concat else sum(outs) / heads
    out = out + bias
    return jnp.where(out > 0, out, jnp.exp(out) - 1.0)


def _ref_forward(x, edge_index, p):
    n = x.shape[0]
    adj = _build_adj(edge_index, n)
    h1 = _ref_gat_layer(x, adj, p["w1"], p["att_src1"], p["att_dst1"], p["b1"],
                        p["heads1"], p["hid"], True)
    h2 = _ref_gat_layer(h1, adj, p["w2"], p["att_src2"], p["att_dst2"], p["b2"],
                        p["heads2"], p["emb"], False)
    z = h2 @ p["wl"] + p["bl"]
    return jax.nn.log_softmax(z, axis=-1)


# ----------------------------------------------------------------------------
# Main
# ----------------------------------------------------------------------------
if __name__ == "__main__":
    # Small shapes consistent with the module structure (2 row tiles of 128)
    N = 256           # number of graph nodes
    F_IN = 256        # num_features
    HID = 32          # num_hidden
    CLASSES = 6       # num_classes
    HEADS = [2, 1]    # num_heads
    EMB = HID * HEADS[0]
    E = 1024          # number of directed edges

    key = jax.random.PRNGKey(0)
    ks = jax.random.split(key, 12)

    def glorot(k, shape):
        fan_in, fan_out = shape[0], shape[-1]
        scale = jnp.sqrt(6.0 / (fan_in + fan_out))
        return jax.random.uniform(k, shape, jnp.float32, -scale, scale)

    params = {
        "heads1": HEADS[0], "heads2": HEADS[1], "hid": HID, "emb": EMB,
        # conv1: in=F_IN, out=HID, heads=2, concat=True
        "w1": glorot(ks[0], (F_IN, HEADS[0] * HID)),
        "att_src1": 0.1 * jax.random.normal(ks[1], (HEADS[0], HID), jnp.float32),
        "att_dst1": 0.1 * jax.random.normal(ks[2], (HEADS[0], HID), jnp.float32),
        "b1": 0.01 * jax.random.normal(ks[3], (1, HEADS[0] * HID), jnp.float32),
        # conv2: in=EMB, out=EMB, heads=1, concat=False
        "w2": glorot(ks[4], (EMB, HEADS[1] * EMB)),
        "att_src2": 0.1 * jax.random.normal(ks[5], (HEADS[1], EMB), jnp.float32),
        "att_dst2": 0.1 * jax.random.normal(ks[6], (HEADS[1], EMB), jnp.float32),
        "b2": 0.01 * jax.random.normal(ks[7], (1, EMB), jnp.float32),
        # lin: EMB -> CLASSES
        "wl": glorot(ks[8], (EMB, CLASSES)),
        "bl": 0.01 * jax.random.normal(ks[9], (1, CLASSES), jnp.float32),
    }

    x = jax.random.normal(ks[10], (N, F_IN), jnp.float32)
    edge_index = jax.random.randint(ks[11], (2, E), 0, N, jnp.int32)

    out = jax.block_until_ready(gat_citeseer_forward(x, edge_index, params))
    ref = jax.block_until_ready(_ref_forward(x, edge_index, params))

    assert out.shape == (N, CLASSES)
    # bf16 matmul operands everywhere + folded bf16 coefficient weights + EUP
    # approx reciprocal (vs the reference's exact softmax) => allow 3e-2.
    assert jnp.allclose(out, ref, rtol=3e-2, atol=3e-2), "mismatch vs reference"
    print("KERNEL_OK")
</pallas_src>

<mosaic_0001>
module attributes {stable_mosaic.version = 11 : i64} {
  func.func @gat_proj_kernel(%arg0: i32, %arg1: memref<128x256xbf16, #tpu.memory_space<vmem>>, %arg2: memref<256x68xbf16, #tpu.memory_space<vmem>>, %arg3: memref<2x128x32xbf16, #tpu.memory_space<vmem>>, %arg4: memref<128x4xf32, #tpu.memory_space<vmem>>) attributes {dimension_semantics = [#tpu.dimension_semantics<parallel>], iteration_bounds = array<i64: 2>, scalar_prefetch = 0 : i64, scratch_operands = 0 : i64, tpu.core_type = #tpu.core_type<tc>, window_params = [{transform_indices = @transform_0, window_bounds = array<i64: 128, 256>}, {pipeline_mode = #tpu.pipeline_mode<synchronous>, transform_indices = @transform_1, window_bounds = array<i64: 256, 68>}, {transform_indices = @transform_2, window_bounds = array<i64: 2, 128, 32>}, {transform_indices = @transform_3, window_bounds = array<i64: 128, 4>}]} {
    %c0 = arith.constant 0 : index
    %c0_0 = arith.constant 0 : index
    %0 = vector.load %arg1[%c0, %c0_0] : memref<128x256xbf16, #tpu.memory_space<vmem>>, vector<128x256xbf16>
    %c0_1 = arith.constant 0 : index
    %c0_2 = arith.constant 0 : index
    %1 = vector.load %arg2[%c0_1, %c0_2] : memref<256x68xbf16, #tpu.memory_space<vmem>>, vector<256x68xbf16>
    %cst = arith.constant dense<0.000000e+00> : vector<128x68xf32>
    %2 = tpu.matmul %0, %1, %cst {dimension_numbers = #tpu.dot_dimension_numbers<[1], [0], [0], [1], [0, 0, 1, 1], [], []>} : vector<128x256xbf16>, vector<256x68xbf16>, vector<128x68xf32> -> vector<128x68xf32>
    %3 = vector.extract_strided_slice %2 {offsets = [0, 0], sizes = [128, 32], strides = [1, 1]} : vector<128x68xf32> to vector<128x32xf32>
    %4 = arith.truncf %3 : vector<128x32xf32> to vector<128x32xbf16>
    %c0_3 = arith.constant 0 : index
    %c0_4 = arith.constant 0 : index
    %c0_5 = arith.constant 0 : index
    %5 = vector.load %arg3[%c0_3, %c0_4, %c0_5] : memref<2x128x32xbf16, #tpu.memory_space<vmem>>, vector<1x128x32xbf16>
    %6 = vector.shape_cast %5 : vector<1x128x32xbf16> to vector<128x32xbf16>
    %7 = vector.shape_cast %4 : vector<128x32xbf16> to vector<1x128x32xbf16>
    tpu.vector_store %arg3[%c0_3, %c0_4, %c0_5], %7 {strides = array<i32>} : memref<2x128x32xbf16, #tpu.memory_space<vmem>>, vector<1x128x32xbf16>,
    %8 = vector.extract_strided_slice %2 {offsets = [0, 32], sizes = [128, 32], strides = [1, 1]} : vector<128x68xf32> to vector<128x32xf32>
    %9 = arith.truncf %8 : vector<128x32xf32> to vector<128x32xbf16>
    %c1 = arith.constant 1 : index
    %c0_6 = arith.constant 0 : index
    %c0_7 = arith.constant 0 : index
    %10 = vector.load %arg3[%c1, %c0_6, %c0_7] : memref<2x128x32xbf16, #tpu.memory_space<vmem>>, vector<1x128x32xbf16>
    %11 = vector.shape_cast %10 : vector<1x128x32xbf16> to vector<128x32xbf16>
    %12 = vector.shape_cast %9 : vector<128x32xbf16> to vector<1x128x32xbf16>
    tpu.vector_store %arg3[%c1, %c0_6, %c0_7], %12 {strides = array<i32>} : memref<2x128x32xbf16, #tpu.memory_space<vmem>>, vector<1x128x32xbf16>,
    %13 = vector.extract_strided_slice %2 {offsets = [0, 64], sizes = [128, 4], strides = [1, 1]} : vector<128x68xf32> to vector<128x4xf32>
    %c0_8 = arith.constant 0 : index
    %c0_9 = arith.constant 0 : index
    %14 = vector.load %arg4[%c0_8, %c0_9] : memref<128x4xf32, #tpu.memory_space<vmem>>, vector<128x4xf32>
    tpu.vector_store %arg4[%c0_8, %c0_9], %13 {strides = array<i32>} : memref<128x4xf32, #tpu.memory_space<vmem>>, vector<128x4xf32>,
    return
  }
  func.func @transform_0(%arg0: i32) -> (i32, i32) {
    %c0_i32 = arith.constant 0 : i32
    %c0_i32_0 = arith.constant 0 : i32
    return %arg0, %c0_i32 : i32, i32
  }
  func.func @transform_1(%arg0: i32) -> (i32, i32) {
    %c0_i32 = arith.constant 0 : i32
    %c0_i32_0 = arith.constant 0 : i32
    %c0_i32_1 = arith.constant 0 : i32
    return %c0_i32, %c0_i32_0 : i32, i32
  }
  func.func @transform_2(%arg0: i32) -> (i32, i32, i32) {
    %c0_i32 = arith.constant 0 : i32
    %c0_i32_0 = arith.constant 0 : i32
    %c0_i32_1 = arith.constant 0 : i32
    return %c0_i32, %arg0, %c0_i32_0 : i32, i32, i32
  }
  func.func @transform_3(%arg0: i32) -> (i32, i32) {
    %c0_i32 = arith.constant 0 : i32
    %c0_i32_0 = arith.constant 0 : i32
    return %arg0, %c0_i32 : i32, i32
  }
}

</mosaic_0001>

<bundles_post_ra>
// kernel: tpu_custom_call.1
= control target key start
LH: loop header
LB: loop body
LE: loop exit
PB: predicated region body
PF: predicated region fallthrough
CT: control target
= control target key end

     0   :  { %9 = vsyncpa [#allocation3], 0  ;;  %s1716_s0 = inlined_call_operand.hbm [shape: bf16[256,256], index: 0, kind: input, shape index: {}]   ;;  %s1717_s1 = inlined_call_operand.vmem [shape: bf16[256,68], index: 1, kind: input, shape index: {}]   ;;  %s1718_s2 = inlined_call_operand.vmem [shape: bf16[2,256,32], index: 2, kind: output, shape index: {0}]   ;;  %s1719_s3 = inlined_call_operand.vmem [shape: f32[256,4], index: 3, kind: output, shape index: {1}]  }
   0x1   :  { %11 = vsyncpa [#allocation3 + $0x1], 0  ;;  %s1374_s12 = smov 0   ;;  %s1376_s13 = smov 0  }
   0x2   :  { %s1378_s14 = smov 0   ;;  %s1380_s15 = smov 0  }
   0x3 LB: > { %s1393_s16 = sadd.s32 4294967295, %s1347_s15   ;;  %s1396_s17 = sadd.s32 1, %s1347_s15   ;;  %s1347_s15 = sphi %s1380_s15, %s1729_s15   ;;  %s1343_s14 = sphi %s1378_s14, %s1728_s14   ;;  %s1339_s13 = sphi %s1376_s13, %s1727_s13   ;;  %s1335_s12 = sphi %s1374_s12, %s1726_s12  }
   0x4   : > { %s21_s18 = ssub.s32 %s1347_s15, %s1396_s17  ;;  %s24_s19 = sadd.s32 1, %s1343_s14 }
   0x5   : > { %p22_p0 = scmp.eq.s32.totalorder %s21_s18, 0  ;;  %p31_p1 = scmp.ne.s32.totalorder %s1343_s14, %s1339_s13 }
   0x6   : > { %p32_p2 = scmp.eq.s32.totalorder %s1347_s15, 0  ;;  %p37_p3 = scmp.ne.s32.totalorder %s1339_s13, %s1335_s12 }
   0x7   : > { %s1406_s20 = scalar_select %p22_p0, %s1343_s14, %s24_s19  }
   0x8   : > { %p1408_p4 = por %p32_p2, %p31_p1  ;;  %p38_p5 = scmp.eq.s32.totalorder %s1393_s16, 0 }
   0x9   : > { %p82_p6 = scmp.eq.s32.totalorder %s1393_s16, 1  ;;  %p1206_p8 = scmp.lt.s32.totalorder %s1347_s15, 2 }
   0xa   : > { %p1414_p7 = por %p38_p5, %p37_p3  ;;  %s137_s24 = sand.u32 1, %s1343_s14  }
   0xb   : > { %p1419_p9 = por %p82_p6, %p31_p1  ;;  %s1023_s25 = sshll.u32 %s137_s24, 7 }
   0xc   : > { %s1102_s26 = sshll.u32 %s1347_s15, 11  ;;  %s141_s30 = scalar_lea.vmem [#allocation2], %s1023_s25 }
   0xd   : > { %s1722_s23 = scalar_select %p1419_p9, 1, 0 }
   0xe   : > { %s1428_s29 = scalar_lea.hbm %s1716_s0, %s1102_s26  ;;  %s149_s4 = sshll.u32 %s141_s30, 4  ;;  %s1430_s4 = int_to_ptr.vmem [resolvable:$true] %s149_s4 }
   0xf   : > { %p1434_p10 = pnand %p1206_p8, %p1408_p4  ;;  %s1439_s6 = scalar_lea.sflag [#allocation3], %s137_s24 }
  0x10   : > { %s1283_s7 = scalar_lea.hbm %s1428_s29, 2048  ;;  %s1288_s10 = scalar_lea.hbm %s1716_s0, 4096 }
  0x11   : > { %p1284_p12 = scmp.ne.s32.totalorder %s1428_s29, %s1283_s7  ;;  %p1285_p13 = pneg %p1434_p10 }
  0x12   : > { %p1289_p2 = scmp.lt.u32.totalorder %s1428_s29, %s1716_s0  ;;  %p1290_p3 = scmp.lt.u32.totalorder %s1288_s10, %s1283_s7 }
  0x13   : > { %p1286_p0 = pnand %p1285_p13, %p1284_p12  ;;  %p1292_p5 = scmp.lt.u32.totalorder %s1283_s7, %s1428_s29 }
  0x14   : > { %p1291_p4 = por %p1290_p3, %p1289_p2 }
  0x15   : > { %p1287_p1 = pneg %p1286_p0 }
  0x16   : > { %p1293_p6 = por %p1292_p5, %p1291_p4 }
  0x18   : > { %p1294_p8 = pnand %p1293_p6, %p1287_p1 }
  0x1a   : > { %1297 = shalt.err (!%p1294_p8)
}
  0x1b   : > { %s1298_s18 = scalar_lea.vmem %s1430_s4, 2048  ;;  %s1349_s19 = smov [#allocation2]  }
  0x1c   : > { %p1299_p12 = scmp.ne.s32.totalorder %s1430_s4, %s1298_s18  ;;  %s1303_s21 = sshll.u32 %s1349_s19, 4  ;;  %s1304_s21 = int_to_ptr.vmem [resolvable:$false] %s1303_s21 }
  0x1d   : > { %s1305_s24 = scalar_lea.vmem %s1304_s21, 4096  ;;  %p1306_p9 = scmp.lt.s32.totalorder %s1430_s4, %s1304_s21 }
  0x1e   : > { %p1301_p0 = pnand %p1299_p12, %p1285_p13  ;;  %p1307_p2 = scmp.lt.s32.totalorder %s1305_s24, %s1298_s18 }
  0x20   : > { %p1302_p11 = pneg %p1301_p0  ;;  %p1308_p3 = por %p1307_p2, %p1306_p9 }
  0x22   : > { %p1309_p4 = pnand %p1308_p3, %p1302_p11 }
  0x24   : > { %1312 = shalt.err (!%p1309_p4)
}
  0x25   : > { %s1350_s25 = smov 128   ;;  %s1351_s26 = smov 8  }
  0x26   : > { %1205 = dma.hbm_to_vmem [thread:$0]  (!%p1434_p10), %s1428_s29, 2048, %s1430_s4, %s1439_s6, %s1350_s25, %s1350_s25, %s1351_s26  }
  0x27   : > { %p157_p13 = scmp.lt.s32.totalorder %s1347_s15, 3  ;;  %p1724_p1 = scmp.ge.s32.totalorder %s1347_s15, 1 }
  0x29   : > { %p158_p5 = pnand %p1724_p1, %p157_p13 }
  0x2a   : > { %s163_s27 = sand.u32 (!%p158_p5), 1, %s1339_s13  }
  0x2b   : > { %161 = sbr.rel (%p158_p5) target bundleno = 481 (0x1e1), region = 28  ;;  %s1471_s28 = sshll.u32 (!%p158_p5), %s163_s27, 7 }
  0x2c   : > { %s164_s30 = scalar_lea.sflag (!%p158_p5), [#allocation3], %s163_s27  ;;  %s1474_s7 = scalar_lea.vmem (!%p158_p5), [#allocation2], %s1471_s28 }
  0x32   : > { %1330 = dma.done.wait (%p1414_p7), %s164_s30, 2048  }
  0x33   : > { %1332 = vsyncadd (%p1414_p7), %s164_s30, 4294965248  ;;  %v1243_v0 = vld [vmem:[%s1717_s1 + $0x40] sm:$0xff]   ;;  %v1245_v2 = vld [vmem:[%s1717_s1 + $0x48] sm:$0xff]   ;;  %vm588_vm0 = vcmask 257024   ;;  %s1352_s21 = smov 64   ;;  %s1030_s24 = sshll.u32 %s1393_s16, 4 }
  0x34   : > { %v1244_v1 = vld [vmem:[%s1717_s1] sm:$0xff]   ;;  %1120 = vmatprep.subr.bf16.mxu0 %v1243_v0  ;;  %1184 = vmatprep.subr.bf16.mxu1 %v1243_v0  ;;  %v1246_v3 = vld [vmem:[%s1717_s1 + $0x8] sm:$0xff]   ;;  %v1247_v4 = vld [vmem:[%s1717_s1 + $0x50] sm:$0xff]   ;;  %p197_p7 = scmp.lt.s32.totalorder %s1030_s24, 31  ;;  %vm734_vm1 = vcmask 31744   ;;  %p1725_p9 = scmp.ne.s32.totalorder %s1722_s23, 0 }
  0x35   : > { %1121 = vmatpush3.bf16.msra.mxu0 %v1244_v1  ;;  %1192 = vmatpush3.bf16.msra.mxu1 %v1244_v1  ;;  %v1248_v5 = vld [vmem:[%s1717_s1 + $0x10] sm:$0xff]   ;;  %v1249_v6 = vld [vmem:[%s1717_s1 + $0x58] sm:$0xff]   ;;  %v1251_v8 = vld [vmem:[%s1717_s1 + $0x60] sm:$0xff]   ;;  %s1119_s5 = sshll.u32 (%p1725_p9), %s1393_s16, 6 }
  0x36   : > { %1122 = vmatprep.subr.bf16.mxu0 %v1245_v2  ;;  %1185 = vmatprep.subr.bf16.mxu1 %v1245_v2  ;;  %v1250_v7 = vld [vmem:[%s1717_s1 + $0x18] sm:$0xff]   ;;  %v1252_v9 = vld [vmem:[%s1717_s1 + $0x20] sm:$0xff]   ;;  %v1253_v10 = vld [vmem:[%s1717_s1 + $0x68] sm:$0xff]   ;;  %s1731_s24 = smov (!%p197_p7, %s1030_s24), 31  ;;  %s765_s4 = scalar_lea.vmem (%p1725_p9), %s1718_s2, %s1119_s5 }
  0x37   : > { %v1261_v11 = vld [vmem:[%s1474_s7 + $0x4] ss:$8 sps:$4 sm:$0xff]   ;;  %v1255_v14 = vld [vmem:[%s1717_s1 + $0x70] sm:$0xff]   ;;  %v1257_v16 = vld [vmem:[%s1717_s1 + $0x78] sm:$0xff]   ;;  %s1031_s25 = sshll.u32 %s1731_s24, 3 }
  0x38   : > { %v1264_v12 = vld [vmem:[%s1474_s7 + $0x44] ss:$8 sps:$4 sm:$0xff]   ;;  %459 = vmatprep.mubr.bf16.mxu0 %v1261_v11  ;;  %v1256_v15 = vld [vmem:[%s1717_s1 + $0x30] sm:$0xff]   ;;  %v1258_v17 = vld [vmem:[%s1717_s1 + $0x38] sm:$0xff]   ;;  %s1615_s30 = scalar_lea.vmem %s1719_s3, %s1031_s25 }
  0x39   : > { %1123 = vmatpush3.bf16.msra.mxu0 %v1246_v3  ;;  %1193 = vmatpush3.bf16.msra.mxu1 %v1246_v3  ;;  %v1254_v13 = vld [vmem:[%s1717_s1 + $0x28] sm:$0xff]   ;;  %v1265_v20 = vld [vmem:[%s1474_s7 + $0x14] ss:$8 sps:$4 sm:$0xff]   ;;  %v1267_v22 = vld [vmem:[%s1474_s7 + $0x10] ss:$8 sps:$4 sm:$0xff]  }
  0x3a   : > { %1124 = vmatprep.subr.bf16.mxu0 %v1247_v4  ;;  %1186 = vmatprep.subr.bf16.mxu1 %v1247_v4  ;;  %v1259_v18 = vld [vmem:[%s1474_s7] ss:$8 sps:$4 sm:$0xff]   ;;  %v1268_v21 = vld [vmem:[%s1474_s7 + $0x54] ss:$8 sps:$4 sm:$0xff]   ;;  %v1270_v23 = vld [vmem:[%s1474_s7 + $0x50] ss:$8 sps:$4 sm:$0xff]  }
  0x3b   : > { %491 = vmatprep.mubr.bf16.mxu1 %v1264_v12  ;;  %v1262_v19 = vld [vmem:[%s1474_s7 + $0x40] ss:$8 sps:$4 sm:$0xff]   ;;  %v1271_v24 = vld [vmem:[%s1474_s7 + $0x24] ss:$8 sps:$4 sm:$0xff]   ;;  %v1277_v28 = vld [vmem:[%s1474_s7 + $0x34] ss:$8 sps:$4 sm:$0xff]  }
  0x3c   : > { %v1274_v25 = vld [vmem:[%s1474_s7 + $0x64] ss:$8 sps:$4 sm:$0xff]   ;;  %v1273_v26 = vld [vmem:[%s1474_s7 + $0x20] ss:$8 sps:$4 sm:$0xff]   ;;  %v1280_v29 = vld [vmem:[%s1474_s7 + $0x74] ss:$8 sps:$4 sm:$0xff]  }
  0x3d   : > { %1125 = vmatpush3.bf16.msra.mxu0 %v1248_v5  ;;  %1194 = vmatpush3.bf16.msra.mxu1 %v1248_v5  ;;  %v1276_v27 = vld [vmem:[%s1474_s7 + $0x60] ss:$8 sps:$4 sm:$0xff]   ;;  %v1279_v30 = vld [vmem:[%s1474_s7 + $0x30] ss:$8 sps:$4 sm:$0xff]  }
  0x3e   : > { %1126 = vmatprep.subr.bf16.mxu0 %v1249_v6  ;;  %1187 = vmatprep.subr.bf16.mxu1 %v1249_v6  ;;  %v1282_v31 = vld [vmem:[%s1474_s7 + $0x70] ss:$8 sps:$4 sm:$0xff]   ;;  %s1546_s7 = scalar_lea.vmem [#allocation4], %s1471_s28  ;;  %s1353_s28 = smov 96  }
  0x41   : > { %1127 = vmatpush3.bf16.msra.mxu0 %v1250_v7  ;;  %1195 = vmatpush3.bf16.msra.mxu1 %v1250_v7 }
  0x42   : > { %1128 = vmatprep.subr.bf16.mxu0 %v1251_v8  ;;  %1188 = vmatprep.subr.bf16.mxu1 %v1251_v8 }
  0x45   : > { %1129 = vmatpush3.bf16.msra.mxu0 %v1252_v9  ;;  %1196 = vmatpush3.bf16.msra.mxu1 %v1252_v9 }
  0x46   : > { %1130 = vmatprep.subr.bf16.mxu0 %v1253_v10  ;;  %1189 = vmatprep.subr.bf16.mxu1 %v1253_v10 }
  0x49   : > { %1131 = vmatpush3.bf16.msra.mxu0 %v1254_v13  ;;  %1197 = vmatpush3.bf16.msra.mxu1 %v1254_v13 }
  0x4a   : > { %1132 = vmatprep.subr.bf16.mxu0 %v1255_v14  ;;  %1190 = vmatprep.subr.bf16.mxu1 %v1255_v14 }
  0x4d   : > { %1133 = vmatpush3.bf16.msra.mxu0 %v1256_v15  ;;  %1198 = vmatpush3.bf16.msra.mxu1 %v1256_v15 }
  0x4e   : > { %1134 = vmatprep.subr.bf16.mxu0 %v1257_v16  ;;  %1191 = vmatprep.subr.bf16.mxu1 %v1257_v16 }
  0x51   : > { %1135 = vmatpush3.bf16.msra.mxu0 %v1258_v17  ;;  %1199 = vmatpush3.bf16.msra.mxu1 %v1258_v17 }
  0x54   : > { %460 = vmatmul.mubr.bf16.vlgmr.msra.gmra.mrb[0].mxu0 %v1259_v18  ;;  %492 = vmatmul.mubr.bf16.vlgmr.msra.gmra.mrb[0].mxu1 %v1262_v19 }
  0x55   : > { %467 = vmatprep.mubr.bf16.mxu0 %v1265_v20  ;;  %499 = vmatprep.mubr.bf16.mxu1 %v1268_v21 }
  0x5c   : > { %468 = vmatmul.mubr.bf16.gmra.mrb[4].mxu0 %v1267_v22  ;;  %500 = vmatmul.mubr.bf16.gmra.mrb[4].mxu1 %v1270_v23 }
  0x5d   : > { %475 = vmatprep.mubr.bf16.mxu0 %v1271_v24  ;;  %507 = vmatprep.mubr.bf16.mxu1 %v1274_v25 }
  0x64   : > { %476 = vmatmul.mubr.bf16.gmra.mrb[8].mxu0 %v1273_v26  ;;  %508 = vmatmul.mubr.bf16.gmra.mrb[8].mxu1 %v1276_v27 }
  0x65   : > { %483 = vmatprep.mubr.bf16.mxu0 %v1277_v28  ;;  %515 = vmatprep.mubr.bf16.mxu1 %v1280_v29 }
  0x6c   : > { %484 = vmatmul.mubr.bf16.gmra.mrb[12].mxu0 %v1279_v30  ;;  %516 = vmatmul.mubr.bf16.gmra.mrb[12].mxu1 %v1282_v31 }
 0x127   : > { %v1136_v32 = vpop.f32.mrb[0].mxu0  ;;  %v1160_v33 = vpop.f32.mrb[0].mxu1 }
 0x128   : > { %v1137_v34 = vpop.f32.mrb[1].mxu0  ;;  %v1161_v35 = vpop.f32.mrb[1].mxu1 }
 0x129   : > { %v1138_v36 = vadd.f32 %v1137_v34, %v1136_v32  ;;  %v1139_v37 = vpop.f32.mrb[2].mxu0  ;;  %v1162_v38 = vadd.f32 %v1161_v35, %v1160_v33  ;;  %v1163_v39 = vpop.f32.mrb[2].mxu1 }
 0x12a   : > { %v1140_v40 = vpop.f32.mrb[3].mxu0  ;;  %v1164_v41 = vpop.f32.mrb[3].mxu1 }
 0x12b   : > { %v1103_v42 = vpack.c.bf16 %v1138_v36, %v1138_v36  ;;  %v1111_v43 = vpack.c.bf16 %v1162_v38, %v1162_v38  ;;  %v1141_v44 = vadd.f32 %v1140_v40, %v1139_v37  ;;  %v1165_v45 = vadd.f32 %v1164_v41, %v1163_v39  ;;  %686 = vrot.lane.b32.xlu0 %v1138_v36, %s1352_s21 }
 0x12d   : > { %589 = vst.msk [vmem:[%s1546_s7] sm:$0xf] %vm588_vm0, %v1103_v42  ;;  %597 = vst.msk [vmem:[%s1546_s7 + $0x20] sm:$0xf] %vm588_vm0, %v1111_v43  ;;  %v1104_v46 = vpack.c.bf16 %v1141_v44, %v1141_v44  ;;  %v1112_v47 = vpack.c.bf16 %v1165_v45, %v1165_v45  ;;  %688 = vrot.lane.b32.xlu1 %v1141_v44, %s1352_s21 }
 0x12f   : > { %590 = vst.msk [vmem:[%s1546_s7 + $0x4] sm:$0xf] %vm588_vm0, %v1104_v46  ;;  %598 = vst.msk [vmem:[%s1546_s7 + $0x24] sm:$0xf] %vm588_vm0, %v1112_v47  ;;  %702 = vrot.lane.b32.xlu0 %v1162_v38, %s1352_s21  ;;  %v1142_v48 = vpop.f32.mrb[4].mxu0  ;;  %v1166_v49 = vpop.f32.mrb[4].mxu1 }
 0x130   : > { %v1143_v50 = vpop.f32.mrb[5].mxu0  ;;  %v1167_v51 = vpop.f32.mrb[5].mxu1 }
 0x131   : > { %v1144_v52 = vadd.f32 %v1143_v50, %v1142_v48  ;;  %704 = vrot.lane.b32.xlu1 %v1165_v45, %s1352_s21  ;;  %v1145_v53 = vpop.f32.mrb[6].mxu0  ;;  %v1168_v54 = vadd.f32 %v1167_v51, %v1166_v49  ;;  %v1169_v55 = vpop.f32.mrb[6].mxu1 }
 0x132   : > { %v1146_v56 = vpop.f32.mrb[7].mxu0  ;;  %v1170_v57 = vpop.f32.mrb[7].mxu1 }
 0x133   : > { %v1105_v58 = vpack.c.bf16 %v1144_v52, %v1144_v52  ;;  %v1147_v59 = vadd.f32 %v1146_v56, %v1145_v53  ;;  %605 = vrot.lane.b32.xlu0 %v1103_v42, %s1353_s28  ;;  %v1113_v60 = vpack.c.bf16 %v1168_v54, %v1168_v54  ;;  %v1171_v61 = vadd.f32 %v1170_v57, %v1169_v55 }
 0x135   : > { %591 = vst.msk [vmem:[%s1546_s7 + $0x8] sm:$0xf] %vm588_vm0, %v1105_v58  ;;  %v1106_v62 = vpack.c.bf16 %v1147_v59, %v1147_v59  ;;  %623 = vrot.lane.b32.xlu1 %v1112_v47, %s1353_s28  ;;  %599 = vst.msk [vmem:[%s1546_s7 + $0x28] sm:$0xf] %vm588_vm0, %v1113_v60  ;;  %v1114_v63 = vpack.c.bf16 %v1171_v61, %v1171_v61 }
 0x137   : > { %592 = vst.msk [vmem:[%s1546_s7 + $0xc] sm:$0xf] %vm588_vm0, %v1106_v62  ;;  %621 = vrot.lane.b32.xlu0 %v1111_v43, %s1353_s28  ;;  %600 = vst.msk [vmem:[%s1546_s7 + $0x2c] sm:$0xf] %vm588_vm0, %v1114_v63  ;;  %v1148_v0 = vpop.f32.mrb[8].mxu0  ;;  %v1172_v1 = vpop.f32.mrb[8].mxu1 }
 0x138   : > { %v1149_v2 = vpop.f32.mrb[9].mxu0  ;;  %v1173_v3 = vpop.f32.mrb[9].mxu1 }
 0x139   : > { %609 = vrot.lane.b32.xlu1 %v1105_v58, %s1353_s28  ;;  %v1150_v4 = vadd.f32 %v1149_v2, %v1148_v0  ;;  %v1151_v5 = vpop.f32.mrb[10].mxu0  ;;  %v1174_v6 = vadd.f32 %v1173_v3, %v1172_v1  ;;  %v1175_v7 = vpop.f32.mrb[10].mxu1  ;;  %v781_v0 = vld [vmem:[%s1546_s7] sm:$0xff] (%p1725_p9)  }
 0x13a   : > { %v1152_v8 = vpop.f32.mrb[11].mxu0  ;;  %v1176_v9 = vpop.f32.mrb[11].mxu1  ;;  %782 = vst [vmem:[%s765_s4] sm:$0xff] (%p1725_p9), %v781_v0  }
 0x13b   : > { %607 = vrot.lane.b32.xlu0 %v1104_v46, %s1353_s28  ;;  %v1107_v10 = vpack.c.bf16 %v1150_v4, %v1150_v4  ;;  %v1153_v11 = vadd.f32 %v1152_v8, %v1151_v5  ;;  %v1115_v12 = vpack.c.bf16 %v1174_v6, %v1174_v6  ;;  %v1177_v13 = vadd.f32 %v1176_v9, %v1175_v7 }
 0x13d   : > { %692 = vrot.lane.b32.xlu1 %v1147_v59, %s1352_s21  ;;  %593 = vst.msk [vmem:[%s1546_s7 + $0x10] sm:$0xf] %vm588_vm0, %v1107_v10  ;;  %v1108_v14 = vpack.c.bf16 %v1153_v11, %v1153_v11  ;;  %601 = vst.msk [vmem:[%s1546_s7 + $0x30] sm:$0xf] %vm588_vm0, %v1115_v12  ;;  %v1116_v15 = vpack.c.bf16 %v1177_v13, %v1177_v13 }
 0x13e   : > { %v785_v1 = vld [vmem:[%s1546_s7 + $0x8] sm:$0xff] (%p1725_p9)  }
 0x13f   : > { %690 = vrot.lane.b32.xlu0 %v1144_v52, %s1352_s21  ;;  %594 = vst.msk [vmem:[%s1546_s7 + $0x14] sm:$0xf] %vm588_vm0, %v1108_v14  ;;  %602 = vst.msk [vmem:[%s1546_s7 + $0x34] sm:$0xf] %vm588_vm0, %v1116_v15  ;;  %v1154_v16 = vpop.f32.mrb[12].mxu0  ;;  %v1178_v17 = vpop.f32.mrb[12].mxu1 }
 0x140   : > { %v1155_v18 = vpop.f32.mrb[13].mxu0  ;;  %v1179_v19 = vpop.f32.mrb[13].mxu1  ;;  %v801_v5 = vld [vmem:[%s1546_s7 + $0x28] sm:$0xff] (%p1725_p9)   ;;  %786 = vst [vmem:[%s765_s4 + $0x8] sm:$0xff] (%p1725_p9), %v785_v1  }
 0x141   : > { %708 = vrot.lane.b32.xlu1 %v1171_v61, %s1352_s21  ;;  %v1156_v20 = vadd.f32 %v1155_v18, %v1154_v16  ;;  %v1157_v21 = vpop.f32.mrb[14].mxu0  ;;  %v1180_v22 = vadd.f32 %v1179_v19, %v1178_v17  ;;  %v1181_v23 = vpop.f32.mrb[14].mxu1  ;;  %802 = vst [vmem:[%s765_s4 + $0x28] sm:$0xff] (%p1725_p9), %v801_v5  }
 0x142   : > { %v1158_v24 = vpop.f32.mrb[15].mxu0  ;;  %v1182_v25 = vpop.f32.mrb[15].mxu1 }
 0x143   : > { %706 = vrot.lane.b32.xlu0 %v1168_v54, %s1352_s21  ;;  %v1109_v26 = vpack.c.bf16 %v1156_v20, %v1156_v20  ;;  %v1159_v27 = vadd.f32 %v1158_v24, %v1157_v21  ;;  %v1117_v28 = vpack.c.bf16 %v1180_v22, %v1180_v22  ;;  %v1183_v29 = vadd.f32 %v1182_v25, %v1181_v23 }
 0x145   : > { %611 = vrot.lane.b32.xlu1 %v1106_v62, %s1353_s28  ;;  %595 = vst.msk [vmem:[%s1546_s7 + $0x18] sm:$0xf] %vm588_vm0, %v1109_v26  ;;  %v1110_v30 = vpack.c.bf16 %v1159_v27, %v1159_v27  ;;  %603 = vst.msk [vmem:[%s1546_s7 + $0x38] sm:$0xf] %vm588_vm0, %v1117_v28  ;;  %v1118_v31 = vpack.c.bf16 %v1183_v29, %v1183_v29 }
 0x146   : > { %v789_v2 = vld [vmem:[%s1546_s7 + $0x10] sm:$0xff] (%p1725_p9)  }
 0x147   : > { %625 = vrot.lane.b32.xlu0 %v1113_v60, %s1353_s28  ;;  %596 = vst.msk [vmem:[%s1546_s7 + $0x1c] sm:$0xf] %vm588_vm0, %v1110_v30  ;;  %604 = vst.msk [vmem:[%s1546_s7 + $0x3c] sm:$0xf] %vm588_vm0, %v1118_v31 }
 0x148   : > { %790 = vst [vmem:[%s765_s4 + $0x10] sm:$0xff] (%p1725_p9), %v789_v2  }
 0x149   : > { %627 = vrot.lane.b32.xlu1 %v1114_v63, %s1353_s28 }
 0x14b   : > { %694 = vrot.lane.b32.xlu0 %v1150_v4, %s1352_s21  ;;  %v797_v4 = vld [vmem:[%s1546_s7 + $0x20] sm:$0xff] (%p1725_p9)  }
 0x14c   : > { %798 = vst [vmem:[%s765_s4 + $0x20] sm:$0xff] (%p1725_p9), %v797_v4  }
 0x14d   : > { %696 = vrot.lane.b32.xlu1 %v1153_v11, %s1352_s21 }
 0x14e   : > { %v793_v3 = vld [vmem:[%s1546_s7 + $0x18] sm:$0xff] (%p1725_p9)  }
 0x14f   : > { %710 = vrot.lane.b32.xlu0 %v1174_v6, %s1352_s21  ;;  %794 = vst [vmem:[%s765_s4 + $0x18] sm:$0xff] (%p1725_p9), %v793_v3   ;;  %v805_v6 = vld [vmem:[%s1546_s7 + $0x30] sm:$0xff] (%p1725_p9)   ;;  %v809_v7 = vld [vmem:[%s1546_s7 + $0x38] sm:$0xff] (%p1725_p9)  }
 0x150   : > { %806 = vst [vmem:[%s765_s4 + $0x30] sm:$0xff] (%p1725_p9), %v805_v6   ;;  %810 = vst [vmem:[%s765_s4 + $0x38] sm:$0xff] (%p1725_p9), %v809_v7  }
 0x151   : > { %712 = vrot.lane.b32.xlu1 %v1177_v13, %s1352_s21 }
 0x153   : > { %613 = vrot.lane.b32.xlu0 %v1107_v10, %s1353_s28 }
 0x155   : > { %615 = vrot.lane.b32.xlu1 %v1108_v14, %s1353_s28 }
 0x157   : > { %629 = vrot.lane.b32.xlu0 %v1115_v12, %s1353_s28 }
 0x159   : > { %631 = vrot.lane.b32.xlu1 %v1116_v15, %s1353_s28 }
 0x15b   : > { %698 = vrot.lane.b32.xlu0 %v1156_v20, %s1352_s21 }
 0x15d   : > { %700 = vrot.lane.b32.xlu1 %v1159_v27, %s1352_s21 }
 0x15f   : > { %617 = vrot.lane.b32.xlu0 %v1109_v26, %s1353_s28 }
 0x161   : > { %619 = vrot.lane.b32.xlu1 %v1110_v30, %s1353_s28 }
 0x163   : > { %633 = vrot.lane.b32.xlu0 %v1117_v28, %s1353_s28 }
 0x165   : > { %635 = vrot.lane.b32.xlu1 %v1118_v31, %s1353_s28 }
 0x167   : > { %714 = vrot.lane.b32.xlu0 %v1180_v22, %s1352_s21 }
 0x169   : > { %716 = vrot.lane.b32.xlu1 %v1183_v29, %s1352_s21 }
 0x19d   : > { %v687_v32 = vpop.permute.xlu0 %686 }
 0x19e   : > { %735 = vst.msk [vmem:[%s1615_s30] sm:$0xff] %vm734_vm1, %v687_v32 }
 0x19f   : > { %v689_v33 = vpop.permute.xlu1 %688 }
 0x1a0   : > { %736 = vst.msk [vmem:[%s1615_s30 + $0x8] sm:$0xff] %vm734_vm1, %v689_v33 }
 0x1a1   : > { %v703_v34 = vpop.permute.xlu0 %702 }
 0x1a2   : > { %743 = vst.msk [vmem:[%s1615_s30 + $0x40] sm:$0xff] %vm734_vm1, %v703_v34 }
 0x1a3   : > { %v705_v35 = vpop.permute.xlu1 %704 }
 0x1a4   : > { %744 = vst.msk [vmem:[%s1615_s30 + $0x48] sm:$0xff] %vm734_vm1, %v705_v35 }
 0x1a5   : > { %v606_v36 = vpop.permute.xlu0 %605 }
 0x1a6   : > { %1080 = vst.msk [vmem:[%s1546_s7 + $0x40] sm:$0xf] %vm588_vm0, %v606_v36 }
 0x1a7   : > { %v624_v37 = vpop.permute.xlu1 %623 }
 0x1a8   : > { %1089 = vst.msk [vmem:[%s1546_s7 + $0x64] sm:$0xf] %vm588_vm0, %v624_v37 }
 0x1a9   : > { %v622_v38 = vpop.permute.xlu0 %621 }
 0x1aa   : > { %1088 = vst.msk [vmem:[%s1546_s7 + $0x60] sm:$0xf] %vm588_vm0, %v622_v38 }
 0x1ab   : > { %v610_v39 = vpop.permute.xlu1 %609 }
 0x1ac   : > { %1082 = vst.msk [vmem:[%s1546_s7 + $0x48] sm:$0xf] %vm588_vm0, %v610_v39 }
 0x1ad   : > { %v608_v40 = vpop.permute.xlu0 %607 }
 0x1ae   : > { %1081 = vst.msk [vmem:[%s1546_s7 + $0x44] sm:$0xf] %vm588_vm0, %v608_v40 }
 0x1af   : > { %v693_v41 = vpop.permute.xlu1 %692 }
 0x1b0   : > { %738 = vst.msk [vmem:[%s1615_s30 + $0x18] sm:$0xff] %vm734_vm1, %v693_v41 }
 0x1b1   : > { %v691_v42 = vpop.permute.xlu0 %690  ;;  %v829_v12 = vld [vmem:[%s1546_s7 + $0x60] sm:$0xff] (%p1725_p9)  }
 0x1b2   : > { %737 = vst.msk [vmem:[%s1615_s30 + $0x10] sm:$0xff] %vm734_vm1, %v691_v42  ;;  %830 = vst [vmem:[%s765_s4 + $0xa0] sm:$0xff] (%p1725_p9), %v829_v12  }
 0x1b3   : > { %v709_v43 = vpop.permute.xlu1 %708 }
 0x1b4   : > { %746 = vst.msk [vmem:[%s1615_s30 + $0x58] sm:$0xff] %vm734_vm1, %v709_v43 }
 0x1b5   : > { %v707_v44 = vpop.permute.xlu0 %706  ;;  %v813_v8 = vld [vmem:[%s1546_s7 + $0x40] sm:$0xff] (%p1725_p9)  }
 0x1b6   : > { %745 = vst.msk [vmem:[%s1615_s30 + $0x50] sm:$0xff] %vm734_vm1, %v707_v44  ;;  %814 = vst [vmem:[%s765_s4 + $0x80] sm:$0xff] (%p1725_p9), %v813_v8  }
 0x1b7   : > { %v612_v45 = vpop.permute.xlu1 %611 }
 0x1b8   : > { %1083 = vst.msk [vmem:[%s1546_s7 + $0x4c] sm:$0xf] %vm588_vm0, %v612_v45 }
 0x1b9   : > { %v626_v46 = vpop.permute.xlu0 %625 }
 0x1ba   : > { %1090 = vst.msk [vmem:[%s1546_s7 + $0x68] sm:$0xf] %vm588_vm0, %v626_v46 }
 0x1bb   : > { %v628_v47 = vpop.permute.xlu1 %627 }
 0x1bc   : > { %1091 = vst.msk [vmem:[%s1546_s7 + $0x6c] sm:$0xf] %vm588_vm0, %v628_v47 }
 0x1bd   : > { %v695_v48 = vpop.permute.xlu0 %694 }
 0x1be   : > { %739 = vst.msk [vmem:[%s1615_s30 + $0x20] sm:$0xff] %vm734_vm1, %v695_v48 }
 0x1bf   : > { %v697_v49 = vpop.permute.xlu1 %696  ;;  %v817_v9 = vld [vmem:[%s1546_s7 + $0x48] sm:$0xff] (%p1725_p9)  }
 0x1c0   : > { %740 = vst.msk [vmem:[%s1615_s30 + $0x28] sm:$0xff] %vm734_vm1, %v697_v49  ;;  %818 = vst [vmem:[%s765_s4 + $0x88] sm:$0xff] (%p1725_p9), %v817_v9  }
 0x1c1   : > { %v711_v50 = vpop.permute.xlu0 %710 }
 0x1c2   : > { %747 = vst.msk [vmem:[%s1615_s30 + $0x60] sm:$0xff] %vm734_vm1, %v711_v50 }
 0x1c3   : > { %v713_v51 = vpop.permute.xlu1 %712  ;;  %v833_v13 = vld [vmem:[%s1546_s7 + $0x68] sm:$0xff] (%p1725_p9)  }
 0x1c4   : > { %748 = vst.msk [vmem:[%s1615_s30 + $0x68] sm:$0xff] %vm734_vm1, %v713_v51  ;;  %834 = vst [vmem:[%s765_s4 + $0xa8] sm:$0xff] (%p1725_p9), %v833_v13  }
 0x1c5   : > { %v614_v52 = vpop.permute.xlu0 %613 }
 0x1c6   : > { %1084 = vst.msk [vmem:[%s1546_s7 + $0x50] sm:$0xf] %vm588_vm0, %v614_v52 }
 0x1c7   : > { %v616_v53 = vpop.permute.xlu1 %615 }
 0x1c8   : > { %1085 = vst.msk [vmem:[%s1546_s7 + $0x54] sm:$0xf] %vm588_vm0, %v616_v53 }
 0x1c9   : > { %v630_v54 = vpop.permute.xlu0 %629 }
 0x1ca   : > { %1092 = vst.msk [vmem:[%s1546_s7 + $0x70] sm:$0xf] %vm588_vm0, %v630_v54 }
 0x1cb   : > { %v632_v55 = vpop.permute.xlu1 %631 }
 0x1cc   : > { %1093 = vst.msk [vmem:[%s1546_s7 + $0x74] sm:$0xf] %vm588_vm0, %v632_v55 }
 0x1cd   : > { %v699_v56 = vpop.permute.xlu0 %698 }
 0x1ce   : > { %741 = vst.msk [vmem:[%s1615_s30 + $0x30] sm:$0xff] %vm734_vm1, %v699_v56 }
 0x1cf   : > { %v701_v57 = vpop.permute.xlu1 %700  ;;  %v821_v10 = vld [vmem:[%s1546_s7 + $0x50] sm:$0xff] (%p1725_p9)  }
 0x1d0   : > { %742 = vst.msk [vmem:[%s1615_s30 + $0x38] sm:$0xff] %vm734_vm1, %v701_v57  ;;  %822 = vst [vmem:[%s765_s4 + $0x90] sm:$0xff] (%p1725_p9), %v821_v10  }
 0x1d1   : > { %v618_v58 = vpop.permute.xlu0 %617 }
 0x1d2   : > { %1086 = vst.msk [vmem:[%s1546_s7 + $0x58] sm:$0xf] %vm588_vm0, %v618_v58 }
 0x1d3   : > { %v620_v59 = vpop.permute.xlu1 %619  ;;  %v837_v14 = vld [vmem:[%s1546_s7 + $0x70] sm:$0xff] (%p1725_p9)  }
 0x1d4   : > { %1087 = vst.msk [vmem:[%s1546_s7 + $0x5c] sm:$0xf] %vm588_vm0, %v620_v59  ;;  %838 = vst [vmem:[%s765_s4 + $0xb0] sm:$0xff] (%p1725_p9), %v837_v14  }
 0x1d5   : > { %v634_v60 = vpop.permute.xlu0 %633 }
 0x1d6   : > { %1094 = vst.msk [vmem:[%s1546_s7 + $0x78] sm:$0xf] %vm588_vm0, %v634_v60  ;;  %762 = sbr.rel (!%p1725_p9) target bundleno = 481 (0x1e1), region = 36 }
 0x1d7   : > { %v636_v61 = vpop.permute.xlu1 %635 }
 0x1d8   : > { %1095 = vst.msk [vmem:[%s1546_s7 + $0x7c] sm:$0xf] %vm588_vm0, %v636_v61 }
 0x1d9   : > { %v715_v62 = vpop.permute.xlu0 %714 }
 0x1da   : > { %749 = vst.msk [vmem:[%s1615_s30 + $0x70] sm:$0xff] %vm734_vm1, %v715_v62 }
 0x1db   : > { %v717_v63 = vpop.permute.xlu1 %716  ;;  %v825_v11 = vld [vmem:[%s1546_s7 + $0x58] sm:$0xff] (%p1725_p9)  }
 0x1dc   : > { %750 = vst.msk [vmem:[%s1615_s30 + $0x78] sm:$0xff] %vm734_vm1, %v717_v63  ;;  %826 = vst [vmem:[%s765_s4 + $0x98] sm:$0xff] (%p1725_p9), %v825_v11  }
 0x1df   : > { %v841_v15 = vld [vmem:[%s1546_s7 + $0x78] sm:$0xff]  }
 0x1e0   : > { %842 = vst [vmem:[%s765_s4 + $0xb8] sm:$0xff] %v841_v15  }
 0x1e1 PF: > { %p14_p10 = scmp.ge.s32.totalorder %s1396_s17, 4   ;;  %s1726_s12 = smov %s1339_s13 }
 0x1e2   : > { %s1727_s13 = smov %s1343_s14  ;;  %s1728_s14 = smov %s1406_s20 }
 0x1e3   : > { %s1729_s15 = smov %s1396_s17  ;;  %16 = sbr.rel (!%p14_p10) target bundleno = 3 (0x3), region = 122 }
 0x1ea   :  { %953 = vsyncpa [#allocation3], 1 }
 0x1eb   :  { %955 = vsyncpa [#allocation3 + $0x1], 1 }

</bundles_post_ra>
